<compile_context>
chip_gen: v6e
topology: v6e:2x2x1
jax: 0.10.0
libtpu: 0.0.40
codegen_flags: <defaults>
</compile_context>

<pallas_src>
import functools

import jax
import jax.numpy as jnp
from jax.experimental import pallas as pl
from jax.experimental.pallas import tpu as pltpu


# ----------------------------- Fused Pallas kernel -------------------------- #

def _mab_fused_kernel(q_in_ref, x_ref, adj_ref, w_ref, b_ref, o_ref,
                      *, num_heads, kdim, E, Lq):
    # Static views into the packed parameter slab.
    w_kv = w_ref[:, 0:2 * E]                    # [2*kdim, 2E]  fused K/V projection
    w_q  = w_ref[0:kdim, 2 * E:3 * E]           # [kdim, E]     (scale pre-folded)
    w_o  = w_ref[0:E, 3 * E:4 * E]              # [E, E]        out-projection
    b_kv = b_ref[:, 0:2 * E]                    # [1, 2E]
    b_q  = b_ref[:, 2 * E:3 * E]                # [1, E]
    b_o  = b_ref[:, 3 * E:4 * E]                # [1, E]

    x = x_ref[...]                                                       # [N, kdim]

    # Graph aggregation (shared by K and V branches), then ONE fused K/V matmul.
    agg = jnp.dot(adj_ref[...], x, preferred_element_type=jnp.float32)   # [N, kdim]
    xz = jnp.concatenate([agg, x], axis=-1)                              # [N, 2*kdim]
    kv = jnp.dot(xz, w_kv, preferred_element_type=jnp.float32) + b_kv    # [N, 2E]
    k = kv[:, 0:E]                                                       # [N, E]
    v = kv[:, E:2 * E]                                                   # [N, E]

    # Query projection; the 1/sqrt(head_dim) attention scale is folded into w_q/b_q.
    q = jnp.dot(q_in_ref[...], w_q, preferred_element_type=jnp.float32) + b_q  # [Lq, E]

    # One up-front transpose of K; per-head slices of kT are sublane-aligned (free).
    kT = k.T                                                             # [E, N]

    d = E // num_heads

    # Per-head score tiles, stacked along sublanes for a single batched softmax.
    scores = []
    for h in range(num_heads):
        lo = h * d
        scores.append(jnp.dot(q[:, lo:lo + d], kT[lo:lo + d, :],
                              preferred_element_type=jnp.float32))       # [Lq, N]
    s_all = jnp.concatenate(scores, axis=0)                              # [H*Lq, N]
    s_all = s_all - jnp.max(s_all, axis=-1, keepdims=True)
    p_all = jnp.exp(s_all)
    p_all = p_all * pl.reciprocal(jnp.sum(p_all, axis=-1, keepdims=True),
                                  approx=True)

    # Attention output with the out-projection folded into the head loop:
    #   out = sum_h (p_h @ v_h) @ wo[h*d:(h+1)*d, :]
    # (avoids concatenating 8-lane head outputs; wo row slices are sublane-aligned).
    out = jnp.zeros((Lq, E), jnp.float32)
    for h in range(num_heads):
        lo = h * d
        p_h = p_all[h * Lq:(h + 1) * Lq, :]                              # [Lq, N]
        o_h = jnp.dot(p_h, v[:, lo:lo + d],
                      preferred_element_type=jnp.float32)                # [Lq, d]
        out = out + jnp.dot(o_h, w_o[lo:lo + d, :],
                            preferred_element_type=jnp.float32)          # [Lq, E]

    o_ref[...] = (out + b_o).astype(o_ref.dtype)


# ------------------------------ Wrapper ------------------------------------- #

def mab_forward(params, Q, X, adj, num_heads):
    Lq, kdim = Q.shape
    E = params["wq"].shape[1]
    assert kdim == E, "MAB requires kdim == vdim (v_proj is GraphConv(vdim, vdim))"
    d = E // num_heads
    scale = 1.0 / jnp.sqrt(jnp.float32(d))

    # One-time host-side parameter algebra (small weight-only matmuls):
    # fold the MHA in-projections into the preceding Linear / GraphConv weights,
    # and fold the 1/sqrt(head_dim) attention scale into the q path.
    wq = (params["wq"] @ params["in_wq"]) * scale
    bq = (params["bq"] @ params["in_wq"] + params["in_bq"]) * scale
    wk_rel = params["k_wrel"] @ params["in_wk"]
    wk_root = params["k_wroot"] @ params["in_wk"]
    bk = params["k_brel"] @ params["in_wk"] + params["in_bk"]
    wv_rel = params["v_wrel"] @ params["in_wv"]
    wv_root = params["v_wroot"] @ params["in_wv"]
    bv = params["v_brel"] @ params["in_wv"] + params["in_bv"]
    wo = params["out_w"]
    bo = params["out_b"]

    # Fused K/V projection operand: kv = [agg | x] @ W_kv + b_kv.
    w_kv = jnp.concatenate(
        [jnp.concatenate([wk_rel, wv_rel], axis=1),
         jnp.concatenate([wk_root, wv_root], axis=1)], axis=0)        # [2*kdim, 2E]
    b_kv = jnp.concatenate([bk, bv], axis=1)                          # [1, 2E]

    # Pack all weights into one lane-dense slab and all biases into one row:
    # 5 input DMAs total (Q, X, adj, W_all, B_all) instead of 13.
    w_all = jnp.zeros((2 * kdim, 4 * E), jnp.float32)
    w_all = w_all.at[:, 0:2 * E].set(w_kv)
    w_all = w_all.at[0:kdim, 2 * E:3 * E].set(wq)
    w_all = w_all.at[0:E, 3 * E:4 * E].set(wo)
    b_all = jnp.concatenate([b_kv, bq, bo], axis=1)                   # [1, 4E]

    vmem_spec = pl.BlockSpec(memory_space=pltpu.MemorySpace.VMEM)

    return pl.pallas_call(
        functools.partial(_mab_fused_kernel,
                          num_heads=num_heads, kdim=kdim, E=E, Lq=Lq),
        out_shape=jax.ShapeDtypeStruct((Lq, E), jnp.float32),
        in_specs=[vmem_spec] * 5,
        out_specs=vmem_spec,
    )(Q, X, adj, w_all, b_all)


# ------------------------------ Reference ------------------------------------ #

def mab_reference(params, Q, X, adj, num_heads):
    vdim = params["wq"].shape[1]
    head_dim = vdim // num_heads
    Q1 = Q @ params["wq"] + params["bq"]
    agg = adj @ X
    K1 = agg @ params["k_wrel"] + params["k_brel"] + X @ params["k_wroot"]
    V1 = agg @ params["v_wrel"] + params["v_brel"] + X @ params["v_wroot"]
    q = Q1 @ params["in_wq"] + params["in_bq"]
    k = K1 @ params["in_wk"] + params["in_bk"]
    v = V1 @ params["in_wv"] + params["in_bv"]
    Lq, N = q.shape[0], k.shape[0]
    qh = q.reshape(Lq, num_heads, head_dim).transpose(1, 0, 2)
    kh = k.reshape(N, num_heads, head_dim).transpose(1, 0, 2)
    vh = v.reshape(N, num_heads, head_dim).transpose(1, 0, 2)
    s = jnp.einsum("hqd,hkd->hqk", qh, kh) / jnp.sqrt(jnp.float32(head_dim))
    p = jax.nn.softmax(s, axis=-1)
    oh = jnp.einsum("hqk,hkd->hqd", p, vh)           # [H, Lq, d]
    o = oh.transpose(1, 0, 2).reshape(Lq, vdim)      # concat heads
    return o @ params["out_w"] + params["out_b"]


# ------------------------------ Main ----------------------------------------- #

if __name__ == "__main__":
    kdim = vdim = 32
    num_heads = 4
    Lq = 8        # number of query "seeds"
    N = 16        # number of graph nodes
    n_edges = 40

    key = jax.random.PRNGKey(0)
    ks = jax.random.split(key, 20)

    def winit(k, shape, scale=0.1):
        return (scale * jax.random.normal(k, shape)).astype(jnp.float32)

    params = {
        # q_proj: Linear(kdim, vdim)
        "wq": winit(ks[0], (kdim, vdim)), "bq": winit(ks[1], (1, vdim)),
        # k_proj: GraphConv(kdim, vdim) -> lin_rel (with bias) + lin_root (no bias)
        "k_wrel": winit(ks[2], (kdim, vdim)), "k_brel": winit(ks[3], (1, vdim)),
        "k_wroot": winit(ks[4], (kdim, vdim)),
        # v_proj: GraphConv(vdim, vdim)
        "v_wrel": winit(ks[5], (vdim, vdim)), "v_brel": winit(ks[6], (1, vdim)),
        "v_wroot": winit(ks[7], (vdim, vdim)),
        # MultiheadAttention in-projections (in_proj_weight split into q/k/v)
        # NOTE: (in_features, out_features) layout; real PyTorch checkpoints are
        # (out, in) and would need transposing before use.
        "in_wq": winit(ks[8], (vdim, vdim)), "in_bq": winit(ks[9], (1, vdim)),
        "in_wk": winit(ks[10], (vdim, vdim)), "in_bk": winit(ks[11], (1, vdim)),
        "in_wv": winit(ks[12], (vdim, vdim)), "in_bv": winit(ks[13], (1, vdim)),
        # MultiheadAttention out_proj
        "out_w": winit(ks[14], (vdim, vdim)), "out_b": winit(ks[15], (1, vdim)),
    }

    Q = jax.random.normal(ks[16], (Lq, kdim), dtype=jnp.float32)
    X = jax.random.normal(ks[17], (N, kdim), dtype=jnp.float32)

    # edge_index: (2, E) with row0 = src, row1 = dst (PyG source_to_target flow).
    src = jax.random.randint(ks[18], (n_edges,), 0, N)
    dst = jax.random.randint(ks[19], (n_edges,), 0, N)
    # Dense adjacency A[dst, src] += 1 so (A @ X)[i] = sum over edges (j->i) of X[j].
    adj = jnp.zeros((N, N), dtype=jnp.float32).at[dst, src].add(1.0)

    out = mab_forward(params, Q, X, adj, num_heads)
    out = jax.block_until_ready(out)

    ref = mab_reference(params, Q, X, adj, num_heads)
    assert out.shape == (Lq, vdim)
    # Tolerance accounts for the EUP approx reciprocal in the softmax (~2^-12 rel).
    assert jnp.allclose(out, ref, rtol=1e-3, atol=1e-3), "Pallas output mismatch vs JAX reference"

    print("KERNEL_OK")
</pallas_src>

<mosaic_0001>
module attributes {stable_mosaic.version = 11 : i64} {
  func.func @_mab_fused_kernel(%arg0: memref<8x32xf32, #tpu.memory_space<vmem>>, %arg1: memref<16x32xf32, #tpu.memory_space<vmem>>, %arg2: memref<16x16xf32, #tpu.memory_space<vmem>>, %arg3: memref<64x128xf32, #tpu.memory_space<vmem>>, %arg4: memref<1x128xf32, #tpu.memory_space<vmem>>, %arg5: memref<8x32xf32, #tpu.memory_space<vmem>>) attributes {dimension_semantics = [], scalar_prefetch = 0 : i64, scratch_operands = 0 : i64, tpu.core_type = #tpu.core_type<tc>} {
    %c0 = arith.constant 0 : index
    %c0_0 = arith.constant 0 : index
    %0 = vector.load %arg3[%c0, %c0_0] : memref<64x128xf32, #tpu.memory_space<vmem>>, vector<64x64xf32>
    %c0_1 = arith.constant 0 : index
    %c64 = arith.constant 64 : index
    %1 = vector.load %arg3[%c0_1, %c64] : memref<64x128xf32, #tpu.memory_space<vmem>>, vector<32x32xf32>
    %c0_2 = arith.constant 0 : index
    %c96 = arith.constant 96 : index
    %2 = vector.load %arg3[%c0_2, %c96] : memref<64x128xf32, #tpu.memory_space<vmem>>, vector<32x32xf32>
    %c0_3 = arith.constant 0 : index
    %c0_4 = arith.constant 0 : index
    %3 = vector.load %arg4[%c0_3, %c0_4] : memref<1x128xf32, #tpu.memory_space<vmem>>, vector<1x64xf32>
    %c0_5 = arith.constant 0 : index
    %c64_6 = arith.constant 64 : index
    %4 = vector.load %arg4[%c0_5, %c64_6] : memref<1x128xf32, #tpu.memory_space<vmem>>, vector<1x32xf32>
    %c0_7 = arith.constant 0 : index
    %c96_8 = arith.constant 96 : index
    %5 = vector.load %arg4[%c0_7, %c96_8] : memref<1x128xf32, #tpu.memory_space<vmem>>, vector<1x32xf32>
    %c0_9 = arith.constant 0 : index
    %c0_10 = arith.constant 0 : index
    %6 = vector.load %arg1[%c0_9, %c0_10] : memref<16x32xf32, #tpu.memory_space<vmem>>, vector<16x32xf32>
    %c0_11 = arith.constant 0 : index
    %c0_12 = arith.constant 0 : index
    %7 = vector.load %arg2[%c0_11, %c0_12] : memref<16x16xf32, #tpu.memory_space<vmem>>, vector<16x16xf32>
    %cst = arith.constant dense<0.000000e+00> : vector<16x32xf32>
    %8 = tpu.matmul %7, %6, %cst {dimension_numbers = #tpu.dot_dimension_numbers<[1], [0], [0], [1], [0, 0, 1, 1], [], []>} : vector<16x16xf32>, vector<16x32xf32>, vector<16x32xf32> -> vector<16x32xf32>
    %9 = tpu.concatenate %8, %6 in 1 : vector<16x32xf32>, vector<16x32xf32> -> vector<16x64xf32>
    %cst_13 = arith.constant dense<0.000000e+00> : vector<16x64xf32>
    %10 = tpu.matmul %9, %0, %cst_13 {dimension_numbers = #tpu.dot_dimension_numbers<[1], [0], [0], [1], [0, 0, 1, 1], [], []>} : vector<16x64xf32>, vector<64x64xf32>, vector<16x64xf32> -> vector<16x64xf32>
    %11 = vector.broadcast %3 : vector<1x64xf32> to vector<16x64xf32>
    %12 = arith.addf %10, %11 : vector<16x64xf32>
    %13 = vector.extract_strided_slice %12 {offsets = [0, 0], sizes = [16, 32], strides = [1, 1]} : vector<16x64xf32> to vector<16x32xf32>
    %14 = vector.extract_strided_slice %12 {offsets = [0, 32], sizes = [16, 32], strides = [1, 1]} : vector<16x64xf32> to vector<16x32xf32>
    %c0_14 = arith.constant 0 : index
    %c0_15 = arith.constant 0 : index
    %15 = vector.load %arg0[%c0_14, %c0_15] : memref<8x32xf32, #tpu.memory_space<vmem>>, vector<8x32xf32>
    %cst_16 = arith.constant dense<0.000000e+00> : vector<8x32xf32>
    %16 = tpu.matmul %15, %1, %cst_16 {dimension_numbers = #tpu.dot_dimension_numbers<[1], [0], [0], [1], [0, 0, 1, 1], [], []>} : vector<8x32xf32>, vector<32x32xf32>, vector<8x32xf32> -> vector<8x32xf32>
    %17 = vector.broadcast %4 : vector<1x32xf32> to vector<8x32xf32>
    %18 = arith.addf %16, %17 : vector<8x32xf32>
    %19 = tpu.transpose %13, [1, 0] : vector<16x32xf32> -> vector<32x16xf32>
    %20 = vector.extract_strided_slice %18 {offsets = [0, 0], sizes = [8, 8], strides = [1, 1]} : vector<8x32xf32> to vector<8x8xf32>
    %21 = vector.extract_strided_slice %19 {offsets = [0, 0], sizes = [8, 16], strides = [1, 1]} : vector<32x16xf32> to vector<8x16xf32>
    %cst_17 = arith.constant dense<0.000000e+00> : vector<8x16xf32>
    %22 = tpu.matmul %20, %21, %cst_17 {dimension_numbers = #tpu.dot_dimension_numbers<[1], [0], [0], [1], [0, 0, 1, 1], [], []>} : vector<8x8xf32>, vector<8x16xf32>, vector<8x16xf32> -> vector<8x16xf32>
    %23 = vector.extract_strided_slice %18 {offsets = [0, 8], sizes = [8, 8], strides = [1, 1]} : vector<8x32xf32> to vector<8x8xf32>
    %24 = vector.extract_strided_slice %19 {offsets = [8, 0], sizes = [8, 16], strides = [1, 1]} : vector<32x16xf32> to vector<8x16xf32>
    %cst_18 = arith.constant dense<0.000000e+00> : vector<8x16xf32>
    %25 = tpu.matmul %23, %24, %cst_18 {dimension_numbers = #tpu.dot_dimension_numbers<[1], [0], [0], [1], [0, 0, 1, 1], [], []>} : vector<8x8xf32>, vector<8x16xf32>, vector<8x16xf32> -> vector<8x16xf32>
    %26 = vector.extract_strided_slice %18 {offsets = [0, 16], sizes = [8, 8], strides = [1, 1]} : vector<8x32xf32> to vector<8x8xf32>
    %27 = vector.extract_strided_slice %19 {offsets = [16, 0], sizes = [8, 16], strides = [1, 1]} : vector<32x16xf32> to vector<8x16xf32>
    %cst_19 = arith.constant dense<0.000000e+00> : vector<8x16xf32>
    %28 = tpu.matmul %26, %27, %cst_19 {dimension_numbers = #tpu.dot_dimension_numbers<[1], [0], [0], [1], [0, 0, 1, 1], [], []>} : vector<8x8xf32>, vector<8x16xf32>, vector<8x16xf32> -> vector<8x16xf32>
    %29 = vector.extract_strided_slice %18 {offsets = [0, 24], sizes = [8, 8], strides = [1, 1]} : vector<8x32xf32> to vector<8x8xf32>
    %30 = vector.extract_strided_slice %19 {offsets = [24, 0], sizes = [8, 16], strides = [1, 1]} : vector<32x16xf32> to vector<8x16xf32>
    %cst_20 = arith.constant dense<0.000000e+00> : vector<8x16xf32>
    %31 = tpu.matmul %29, %30, %cst_20 {dimension_numbers = #tpu.dot_dimension_numbers<[1], [0], [0], [1], [0, 0, 1, 1], [], []>} : vector<8x8xf32>, vector<8x16xf32>, vector<8x16xf32> -> vector<8x16xf32>
    %32 = tpu.concatenate %22, %25, %28, %31 in 0 : vector<8x16xf32>, vector<8x16xf32>, vector<8x16xf32>, vector<8x16xf32> -> vector<32x16xf32>
    %cst_21 = arith.constant dense<0xFF800000> : vector<32xf32>
    %33 = vector.multi_reduction <maximumf>, %32, %cst_21 [1] : vector<32x16xf32> to vector<32xf32>
    %34 = vector.shape_cast %33 : vector<32xf32> to vector<32x1xf32>
    %35 = vector.broadcast %34 : vector<32x1xf32> to vector<32x16xf32>
    %36 = arith.subf %32, %35 : vector<32x16xf32>
    %37 = math.exp %36 : vector<32x16xf32>
    %cst_22 = arith.constant dense<0.000000e+00> : vector<32xf32>
    %38 = vector.multi_reduction <add>, %37, %cst_22 [1] : vector<32x16xf32> to vector<32xf32>
    %39 = vector.shape_cast %38 : vector<32xf32> to vector<32x1xf32>
    %40 = tpu.reciprocal %39 {approx = true} : vector<32x1xf32> -> vector<32x1xf32>
    %41 = vector.broadcast %40 : vector<32x1xf32> to vector<32x16xf32>
    %42 = arith.mulf %37, %41 : vector<32x16xf32>
    %cst_23 = arith.constant 0.000000e+00 : f32
    %43 = vector.broadcast %cst_23 : f32 to vector<8x32xf32>
    %44 = vector.extract_strided_slice %42 {offsets = [0, 0], sizes = [8, 16], strides = [1, 1]} : vector<32x16xf32> to vector<8x16xf32>
    %45 = vector.extract_strided_slice %14 {offsets = [0, 0], sizes = [16, 8], strides = [1, 1]} : vector<16x32xf32> to vector<16x8xf32>
    %cst_24 = arith.constant dense<0.000000e+00> : vector<8x8xf32>
    %46 = tpu.matmul %44, %45, %cst_24 {dimension_numbers = #tpu.dot_dimension_numbers<[1], [0], [0], [1], [0, 0, 1, 1], [], []>} : vector<8x16xf32>, vector<16x8xf32>, vector<8x8xf32> -> vector<8x8xf32>
    %47 = vector.extract_strided_slice %2 {offsets = [0, 0], sizes = [8, 32], strides = [1, 1]} : vector<32x32xf32> to vector<8x32xf32>
    %cst_25 = arith.constant dense<0.000000e+00> : vector<8x32xf32>
    %48 = tpu.matmul %46, %47, %cst_25 {dimension_numbers = #tpu.dot_dimension_numbers<[1], [0], [0], [1], [0, 0, 1, 1], [], []>} : vector<8x8xf32>, vector<8x32xf32>, vector<8x32xf32> -> vector<8x32xf32>
    %49 = arith.addf %43, %48 : vector<8x32xf32>
    %50 = vector.extract_strided_slice %42 {offsets = [8, 0], sizes = [8, 16], strides = [1, 1]} : vector<32x16xf32> to vector<8x16xf32>
    %51 = vector.extract_strided_slice %14 {offsets = [0, 8], sizes = [16, 8], strides = [1, 1]} : vector<16x32xf32> to vector<16x8xf32>
    %cst_26 = arith.constant dense<0.000000e+00> : vector<8x8xf32>
    %52 = tpu.matmul %50, %51, %cst_26 {dimension_numbers = #tpu.dot_dimension_numbers<[1], [0], [0], [1], [0, 0, 1, 1], [], []>} : vector<8x16xf32>, vector<16x8xf32>, vector<8x8xf32> -> vector<8x8xf32>
    %53 = vector.extract_strided_slice %2 {offsets = [8, 0], sizes = [8, 32], strides = [1, 1]} : vector<32x32xf32> to vector<8x32xf32>
    %cst_27 = arith.constant dense<0.000000e+00> : vector<8x32xf32>
    %54 = tpu.matmul %52, %53, %cst_27 {dimension_numbers = #tpu.dot_dimension_numbers<[1], [0], [0], [1], [0, 0, 1, 1], [], []>} : vector<8x8xf32>, vector<8x32xf32>, vector<8x32xf32> -> vector<8x32xf32>
    %55 = arith.addf %49, %54 : vector<8x32xf32>
    %56 = vector.extract_strided_slice %42 {offsets = [16, 0], sizes = [8, 16], strides = [1, 1]} : vector<32x16xf32> to vector<8x16xf32>
    %57 = vector.extract_strided_slice %14 {offsets = [0, 16], sizes = [16, 8], strides = [1, 1]} : vector<16x32xf32> to vector<16x8xf32>
    %cst_28 = arith.constant dense<0.000000e+00> : vector<8x8xf32>
    %58 = tpu.matmul %56, %57, %cst_28 {dimension_numbers = #tpu.dot_dimension_numbers<[1], [0], [0], [1], [0, 0, 1, 1], [], []>} : vector<8x16xf32>, vector<16x8xf32>, vector<8x8xf32> -> vector<8x8xf32>
    %59 = vector.extract_strided_slice %2 {offsets = [16, 0], sizes = [8, 32], strides = [1, 1]} : vector<32x32xf32> to vector<8x32xf32>
    %cst_29 = arith.constant dense<0.000000e+00> : vector<8x32xf32>
    %60 = tpu.matmul %58, %59, %cst_29 {dimension_numbers = #tpu.dot_dimension_numbers<[1], [0], [0], [1], [0, 0, 1, 1], [], []>} : vector<8x8xf32>, vector<8x32xf32>, vector<8x32xf32> -> vector<8x32xf32>
    %61 = arith.addf %55, %60 : vector<8x32xf32>
    %62 = vector.extract_strided_slice %42 {offsets = [24, 0], sizes = [8, 16], strides = [1, 1]} : vector<32x16xf32> to vector<8x16xf32>
    %63 = vector.extract_strided_slice %14 {offsets = [0, 24], sizes = [16, 8], strides = [1, 1]} : vector<16x32xf32> to vector<16x8xf32>
    %cst_30 = arith.constant dense<0.000000e+00> : vector<8x8xf32>
    %64 = tpu.matmul %62, %63, %cst_30 {dimension_numbers = #tpu.dot_dimension_numbers<[1], [0], [0], [1], [0, 0, 1, 1], [], []>} : vector<8x16xf32>, vector<16x8xf32>, vector<8x8xf32> -> vector<8x8xf32>
    %65 = vector.extract_strided_slice %2 {offsets = [24, 0], sizes = [8, 32], strides = [1, 1]} : vector<32x32xf32> to vector<8x32xf32>
    %cst_31 = arith.constant dense<0.000000e+00> : vector<8x32xf32>
    %66 = tpu.matmul %64, %65, %cst_31 {dimension_numbers = #tpu.dot_dimension_numbers<[1], [0], [0], [1], [0, 0, 1, 1], [], []>} : vector<8x8xf32>, vector<8x32xf32>, vector<8x32xf32> -> vector<8x32xf32>
    %67 = arith.addf %61, %66 : vector<8x32xf32>
    %68 = vector.broadcast %5 : vector<1x32xf32> to vector<8x32xf32>
    %69 = arith.addf %67, %68 : vector<8x32xf32>
    %c0_32 = arith.constant 0 : index
    %c0_33 = arith.constant 0 : index
    %70 = vector.load %arg5[%c0_32, %c0_33] : memref<8x32xf32, #tpu.memory_space<vmem>>, vector<8x32xf32>
    tpu.vector_store %arg5[%c0_32, %c0_33], %69 {strides = array<i32>} : memref<8x32xf32, #tpu.memory_space<vmem>>, vector<8x32xf32>,
    return
  }
}

</mosaic_0001>

<bundles_post_ra>
// kernel: tpu_custom_call.1
= control target key start
LH: loop header
LB: loop body
LE: loop exit
PB: predicated region body
PF: predicated region fallthrough
CT: control target
= control target key end

     0   :  { %10 = vsyncpa [#allocation3], 0  ;;  %s1944_s0 = inlined_call_operand.hbm [shape: f32[8,32], index: 0, kind: input, shape index: {}]   ;;  %s1945_s1 = inlined_call_operand.hbm [shape: f32[16,32], index: 1, kind: input, shape index: {}]   ;;  %s1946_s2 = inlined_call_operand.hbm [shape: f32[16,16], index: 2, kind: input, shape index: {}]   ;;  %s1947_s3 = inlined_call_operand.hbm [shape: f32[64,128], index: 3, kind: input, shape index: {}]   ;;  %s1948_s4 = inlined_call_operand.vmem [shape: f32[1,128], index: 4, kind: input, shape index: {}]   ;;  %s1949_s5 = inlined_call_operand.hbm [shape: f32[8,32], index: 5, kind: output, shape index: {}]  }
   0x1   :  { %11 = vsyncpa [#allocation6], 0 }
   0x2   :  { %12 = vsyncpa [#allocation9], 0 }
   0x3   :  { %13 = vsyncpa [#allocation4], 0  ;;  %s1711_s18 = smov [#allocation5]  }
   0x4   :  { %s29_s19 = sshll.u32 %s1711_s18, 4  ;;  %s30_s19 = int_to_ptr.vmem [resolvable:$true] %s29_s19 }
   0x5   :  { %s1611_s20 = scalar_lea.vmem %s30_s19, 256  ;;  %p1616_p1 = scmp.lt.s32.totalorder %s30_s19, %s30_s19 }
   0x6   :  { %p1612_p0 = scmp.ne.s32.totalorder %s30_s19, %s1611_s20  ;;  %p1617_p2 = scmp.lt.s32.totalorder %s1611_s20, %s1611_s20 }
   0x8   :  { %p1618_p3 = por %p1617_p2, %p1616_p1 }
   0xa   :  { %p1619_p4 = pnand %p1618_p3, %p1612_p0 }
   0xc   :  { %1622 = shalt.err (!%p1619_p4)
}
   0xd   :  { %s1712_s21 = smov 128   ;;  %s1713_s22 = smov 8  }
   0xe   :  { %35 = dma.hbm_to_vmem [thread:$0]  %s1945_s1, 256, %s30_s19, [#allocation6], %s1712_s21, %s1712_s21, %s1713_s22  }
   0xf   :  { %s1714_s25 = smov [#allocation2]   ;;  %s1715_s27 = smov [#allocation7]  }
  0x10   :  { %s20_s26 = sshll.u32 %s1714_s25, 4  ;;  %s41_s28 = sshll.u32 %s1715_s27, 4  ;;  %s21_s26 = int_to_ptr.vmem [resolvable:$true] %s20_s26  ;;  %s42_s28 = int_to_ptr.vmem [resolvable:$true] %s41_s28 }
  0x11   :  { %s1631_s29 = scalar_lea.vmem %s21_s26, 128  ;;  %p1636_p6 = scmp.lt.s32.totalorder %s21_s26, %s21_s26 }
  0x12   :  { %p1632_p5 = scmp.ne.s32.totalorder %s21_s26, %s1631_s29  ;;  %p1637_p7 = scmp.lt.s32.totalorder %s1631_s29, %s1631_s29 }
  0x14   :  { %p1638_p8 = por %p1637_p7, %p1636_p6 }
  0x16   :  { %p1639_p9 = pnand %p1638_p8, %p1632_p5 }
  0x18   :  { %1642 = shalt.err (!%p1639_p9)
}
  0x19   :  { %23 = dma.hbm_to_vmem [thread:$0]  %s1944_s0, 128, %s21_s26, [#allocation3]  }
  0x1a   :  { %s1651_s7 = scalar_lea.vmem %s42_s28, 256  ;;  %p1656_p11 = scmp.lt.s32.totalorder %s42_s28, %s42_s28 }
  0x1b   :  { %p1652_p10 = scmp.ne.s32.totalorder %s42_s28, %s1651_s7  ;;  %p1657_p12 = scmp.lt.s32.totalorder %s1651_s7, %s1651_s7 }
  0x1d   :  { %p1658_p13 = por %p1657_p12, %p1656_p11 }
  0x1f   :  { %p1659_p0 = pnand %p1658_p13, %p1652_p10 }
  0x21   :  { %1662 = shalt.err (!%p1659_p0)
}
  0x22   :  { %47 = dma.hbm_to_vmem [thread:$0]  %s1946_s2, 256, %s42_s28, [#allocation6], %s1712_s21, %s1712_s21, %s1713_s22  }
  0x23   :  { %s1716_s9 = smov [#allocation8]  }
  0x24   :  { %s53_s10 = sshll.u32 %s1716_s9, 4  ;;  %s54_s10 = int_to_ptr.vmem [resolvable:$true] %s53_s10 }
  0x25   :  { %s1671_s11 = scalar_lea.vmem %s54_s10, 1024  ;;  %p1676_p2 = scmp.lt.s32.totalorder %s54_s10, %s54_s10 }
  0x26   :  { %p1672_p1 = scmp.ne.s32.totalorder %s54_s10, %s1671_s11  ;;  %p1677_p3 = scmp.lt.s32.totalorder %s1671_s11, %s1671_s11 }
  0x28   :  { %p1678_p4 = por %p1677_p3, %p1676_p2 }
  0x2a   :  { %p1679_p5 = pnand %p1678_p4, %p1672_p1 }
  0x2c   :  { %1682 = shalt.err (!%p1679_p5)
}
  0x2d   :  { %59 = dma.hbm_to_vmem [thread:$0]  %s1947_s3, 1024, %s54_s10, [#allocation9], %s1712_s21, %s1712_s21, %s1713_s22  }
  0x2e   :  { %1703 = dma.done.wait [#allocation3], 128  }
  0x2f   :  { %1704 = vsyncadd [#allocation3], 4294967168 }
  0x30   :  { %1705 = dma.done.wait [#allocation6], 512  }
  0x31   :  { %1706 = vsyncadd [#allocation6], 4294966784 }
  0x32   :  { %1707 = dma.done.wait [#allocation9], 1024  }
  0x33   :  { %1708 = vsyncadd [#allocation9], 4294966272  ;;  %vm91_vm0 = vcmask 130048   ;;  %v88_v0 = vld [vmem:[#allocation5 + $0x8] sm:$0xff]  ;;  %v87_v1 = vld [vmem:[#allocation5] sm:$0xff]  ;;  %s1717_s2 = smov 32  }
  0x34   :  { %v89_v2 = vld [vmem:[#allocation7] sm:$0xff]  ;;  %1456 = vmatprep.subr.mxu0 %v88_v0  ;;  %v1781_v3 = vld [vmem:[#allocation8 + $0x18] sm:$0xff]  ;;  %175 = vrot.lane.b32.xlu0 %v87_v1, %s1717_s2  ;;  %s1718_s3 = smov 64   ;;  %v79_v8 = vld [vmem:[#allocation8 + $0x28] sm:$0xff]  ;;  %v1719_v12 = vmov 0.0   ;;  %vm1720_vm1 = vmmov 0  }
  0x35   :  { %1460 = vmatprep.mubr.msk.f32.mxu0 %vm91_vm0, %v89_v2  ;;  %1457 = vmatpush3.msra.mxu0 %v88_v0  ;;  %v90_v4 = vld [vmem:[#allocation7 + $0x8] sm:$0xff]  ;;  %v80_v6 = vld [vmem:[#allocation8 + $0x30] sm:$0xff]  ;;  %v1792_v9 = vld [vmem:[#allocation8 + $0x8] sm:$0xff]  ;;  %vm181_vm2 = vcmask 261120   ;;  %vm190_vm3 = vcmask 523264   ;;  %vm365_vm4 = vcmask 64512  }
  0x36   :  { %v81_v5 = vld [vmem:[#allocation8 + $0x38] sm:$0xff]  ;;  %1458 = vmatprep.subr.mxu0 %v87_v1  ;;  %283 = vrot.lane.b32.xlu1 %v1781_v3, %s1718_s3  ;;  %v1786_v7 = vld [vmem:[#allocation8 + $0x10] sm:$0xff]  ;;  %v78_v10 = vld [vmem:[#allocation8 + $0x20] sm:$0xff]  ;;  %s1722_s15 = smov 112   ;;  %s1723_s16 = smov 104  }
  0x37   :  { %1459 = vmatpush3.msra.mxu0 %v87_v1  ;;  %1463 = vmatprep.subr.mxu1 %v81_v5  ;;  %v1794_v11 = vld [vmem:[#allocation8] sm:$0xff]  ;;  %v1813_v13 = vld [vmem:[%s1948_s4] ss:$0 sm:$0xff]  ;;  %s1721_s4 = smov 120   ;;  %s1724_s17 = smov 96  }
  0x38   :  { %1461 = vmatmul.mubr.msk.f32.vlgmr.msra.gmra.mxu0 %vm91_vm0, %v90_v4  ;;  %1464 = vmatpush3.msra.mxu1 %v81_v5  ;;  %v272_v20 = vld [vmem:[#allocation2] sm:$0xff]  ;;  %s1725_s18 = smov 88   ;;  %s1726_s19 = smov 80  }
  0x39   :  { %177 = vrot.lane.b32.xlu0 %v88_v0, %s1717_s2  ;;  %1465 = vmatprep.subr.mxu1 %v80_v6  ;;  %s1727_s20 = smov 72   ;;  %s1728_s21 = smov [#allocation10]  }
  0x3a   :  { %281 = vrot.lane.b32.xlu1 %v1786_v7, %s1718_s3  ;;  %1466 = vmatpush3.msra.mxu1 %v80_v6  ;;  %s1368_s22 = sshll.u32 %s1728_s21, 4  ;;  %s1369_s22 = int_to_ptr.vmem [resolvable:$true] %s1368_s22 }
  0x3b   :  { %1467 = vmatprep.subr.mxu1 %v79_v8  ;;  %1482 = vmatprep.subr.mxu0 %v1719_v12  ;;  %s1683_s23 = scalar_lea.vmem %s1369_s22, 128  ;;  %p1688_p7 = scmp.lt.s32.totalorder %s1369_s22, %s1369_s22 }
  0x3c   :  { %1468 = vmatpush3.msra.mxu1 %v79_v8  ;;  %1490 = vmatprep.mubr.msk.f32.mxu0 %vm1720_vm1, %v1719_v12  ;;  %p1684_p6 = scmp.ne.s32.totalorder %s1369_s22, %s1683_s23  ;;  %p1689_p8 = scmp.lt.s32.totalorder %s1683_s23, %s1683_s23 }
  0x3d   :  { %279 = vrot.lane.b32.xlu0 %v1792_v9, %s1718_s3  ;;  %1469 = vmatprep.subr.mxu1 %v78_v10 }
  0x3e   :  { %277 = vrot.lane.b32.xlu1 %v1794_v11, %s1718_s3  ;;  %1470 = vmatpush3.msra.mxu1 %v78_v10  ;;  %p1690_p9 = por %p1689_p8, %p1688_p7 }
  0x3f   :  { %1471 = vmatprep.subr.mxu1 %v1781_v3 }
  0x40   :  { %1472 = vmatpush3.msra.mxu1 %v1781_v3  ;;  %p1691_p10 = pnand %p1690_p9, %p1684_p6 }
  0x41   :  { %1473 = vmatprep.subr.mxu1 %v1786_v7  ;;  %289 = vrot.lane.b32.xlu0 %v1813_v13, %s1718_s3 }
  0x42   :  { %1474 = vmatpush3.msra.mxu1 %v1786_v7 }
  0x43   :  { %1475 = vmatprep.subr.mxu1 %v1792_v9 }
  0x44   :  { %1476 = vmatpush3.msra.mxu1 %v1792_v9 }
  0x45   :  { %1477 = vmatprep.subr.mxu1 %v1794_v11 }
  0x46   :  { %1478 = vmatpush3.msra.mxu1 %v1794_v11 }
  0x47   :  { %1500 = vmatprep.subr.mxu1 %v1719_v12 }
  0xa6   :  { %v176_v14 = vpop.permute.xlu0 %175 }
  0xa8   :  { %v284_v15 = vpop.permute.xlu1 %283 }
  0xa9   :  { %1483 = vmatpush3.msra.mxu0 %v284_v15 }
  0xaa   :  { %1484 = vmatprep.subr.mxu0 %v1719_v12 }
  0xab   :  { %v178_v16 = vpop.permute.xlu0 %177 }
  0xac   :  { %v282_v17 = vpop.permute.xlu1 %281 }
  0xad   :  { %1485 = vmatpush3.msra.mxu0 %v282_v17 }
  0xae   :  { %1486 = vmatprep.subr.mxu0 %v1719_v12 }
  0xaf   :  { %v280_v18 = vpop.permute.xlu0 %279 }
  0xb0   :  { %1487 = vmatpush3.msra.mxu0 %v280_v18  ;;  %v278_v19 = vpop.permute.xlu1 %277 }
  0xb1   :  { %1488 = vmatprep.subr.mxu0 %v1719_v12 }
  0xb2   :  { %1489 = vmatpush3.msra.mxu0 %v278_v19 }
  0xb3   :  { %1491 = vmatmul.mubr.msk.f32.vlgmr.msra.gmra.mxu0 %vm181_vm2, %v272_v20  ;;  %1493 = vmatprep.subr.mxu0 %v1719_v12  ;;  %v290_v28 = vpop.permute.xlu0 %289 }
  0xb4   :  { %1497 = vmatprep.mubr.msk.f32.mxu0 %vm1720_vm1, %v1719_v12 }
  0xf8   :  { %v1462_v21 = vpop.f32.mrf.mxu0 }
  0xf9   :  { %v183_v24 = vsel %vm181_vm2, %v1462_v21, %v178_v16 }
  0xfa   :  { %v164_v22 = vpop.f32.mrf.mxu0 }
  0xfb   :  { %v182_v23 = vsel %vm181_vm2, %v164_v22, %v176_v14 }
  0xfc   :  { %1479 = vmatprep.mubr.msk.f32.mxu1 %vm190_vm3, %v182_v23 }
  0xfd   :  { %1480 = vmatmul.mubr.msk.f32.vlgmr.msra.gmra.mxu1 %vm190_vm3, %v183_v24 }
  0xfe   :  { %1504 = vmatprep.mubr.msk.f32.mxu1 %vm1720_vm1, %v1719_v12 }
 0x173   :  { %v361_v25 = vpop.f32.mrf.mxu0 }
 0x174   :  { %v362_v32 = vadd.f32 %v361_v25, %v290_v28 }
 0x175   :  { %v1492_v26 = vpop.f32.mrf.mxu0 }
 0x1bd   :  { %v1481_v27 = vpop.f32.mrf.mxu1 }
 0x1be   :  { %v1831_v29 = vadd.f32 %v1481_v27, %v1813_v13 }
 0x1bf   :  { %v263_v30 = vpop.f32.mrf.mxu1 }
 0x1c0   :  { %v1834_v31 = vadd.f32 %v1813_v13, %v263_v30  ;;  %449 = vrot.lane.b32.xlu1 %v1831_v29, %s1721_s4  ;;  %1494 = vmatpush3.xpose.msk.msra.mxu0 %vm365_vm4, %v1831_v29 }
 0x1c1   :  { %1495 = vmatprep.subr.mxu0 %v1719_v12 }
 0x1c2   :  { %447 = vrot.lane.b32.xlu0 %v1834_v31, %s1721_s4 }
 0x1c4   :  { %445 = vrot.lane.b32.xlu1 %v362_v32, %s1721_s4  ;;  %1496 = vmatpush3.xpose.msk.msra.mxu0 %vm365_vm4, %v1834_v31 }
 0x1c5   :  { %1507 = vmatprep.subr.mxu0 %v1719_v12 }
 0x1c6   :  { %531 = vrot.lane.b32.xlu0 %v1831_v29, %s1722_s15 }
 0x1c7   :  { %1498 = vmatmul.mubr.msk.f32.vlgmr.msra.gmra.mxu0 %vm365_vm4, %v362_v32 }
 0x1c8   :  { %529 = vrot.lane.b32.xlu1 %v1834_v31, %s1722_s15  ;;  %1511 = vmatprep.mubr.msk.f32.mxu0 %vm1720_vm1, %v1719_v12 }
 0x1ca   :  { %613 = vrot.lane.b32.xlu0 %v1831_v29, %s1723_s16 }
 0x1cc   :  { %527 = vrot.lane.b32.xlu1 %v362_v32, %s1722_s15 }
 0x1ce   :  { %611 = vrot.lane.b32.xlu0 %v1834_v31, %s1723_s16 }
 0x1d0   :  { %609 = vrot.lane.b32.xlu1 %v362_v32, %s1723_s16 }
 0x232   :  { %v450_v33 = vpop.permute.xlu1 %449 }
 0x233   :  { %1501 = vmatpush3.xpose.msk.msra.mxu1 %vm365_vm4, %v450_v33 }
 0x234   :  { %v448_v34 = vpop.permute.xlu0 %447  ;;  %1502 = vmatprep.subr.mxu1 %v1719_v12 }
 0x236   :  { %v446_v35 = vpop.permute.xlu1 %445 }
 0x237   :  { %1503 = vmatpush3.xpose.msk.msra.mxu1 %vm365_vm4, %v448_v34 }
 0x238   :  { %v532_v36 = vpop.permute.xlu0 %531  ;;  %1514 = vmatprep.subr.mxu1 %v1719_v12 }
 0x239   :  { %1508 = vmatpush3.xpose.msk.msra.mxu0 %vm365_vm4, %v532_v36 }
 0x23a   :  { %v530_v37 = vpop.permute.xlu1 %529  ;;  %1505 = vmatmul.mubr.msk.f32.vlgmr.msra.gmra.mxu1 %vm365_vm4, %v446_v35  ;;  %1509 = vmatprep.subr.mxu0 %v1719_v12 }
 0x23b   :  { %1518 = vmatprep.mubr.msk.f32.mxu1 %vm1720_vm1, %v1719_v12 }
 0x23c   :  { %v614_v38 = vpop.permute.xlu0 %613 }
 0x23d   :  { %1510 = vmatpush3.xpose.msk.msra.mxu0 %vm365_vm4, %v530_v37  ;;  %1515 = vmatpush3.xpose.msk.msra.mxu1 %vm365_vm4, %v614_v38 }
 0x23e   :  { %v528_v39 = vpop.permute.xlu1 %527  ;;  %1516 = vmatprep.subr.mxu1 %v1719_v12  ;;  %1521 = vmatprep.subr.mxu0 %v1719_v12 }
 0x240   :  { %v612_v40 = vpop.permute.xlu0 %611  ;;  %1512 = vmatmul.mubr.msk.f32.vlgmr.msra.gmra.mxu0 %vm365_vm4, %v528_v39 }
 0x241   :  { %1517 = vmatpush3.xpose.msk.msra.mxu1 %vm365_vm4, %v612_v40  ;;  %1525 = vmatprep.mubr.msk.f32.mxu0 %vm1720_vm1, %v1719_v12 }
 0x242   :  { %v610_v41 = vpop.permute.xlu1 %609  ;;  %1535 = vmatprep.subr.mxu1 %v1719_v12 }
 0x244   :  { %1519 = vmatmul.mubr.msk.f32.vlgmr.msra.gmra.mxu1 %vm365_vm4, %v610_v41 }
 0x245   :  { %1537 = vmatprep.mubr.msk.f32.mxu1 %vm1720_vm1, %v1719_v12 }
 0x287   :  { %v441_v42 = vpop.f32.mrf.mxu0 }
 0x288   :  { %v691_v43 = vsel %vm91_vm0, %v441_v42, -inf }
 0x289   :  { %692 = vmax.xlane.f32.xlu0 %v691_v43  ;;  %v1499_v44 = vpop.f32.mrf.mxu0 }
 0x2fa   :  { %v523_v45 = vpop.f32.mrf.mxu1 }
 0x2fb   :  { %v694_v46 = vsel %vm91_vm0, %v523_v45, -inf }
 0x2fc   :  { %695 = vmax.xlane.f32.xlu1 %v694_v46  ;;  %v1506_v47 = vpop.f32.mrf.mxu1 }
 0x300   :  { %v1874_v48 = vpop.f32.mrf.mxu0 }
 0x302   :  { %v1513_v49 = vpop.f32.mrf.mxu0 }
 0x304   :  { %v1876_v50 = vpop.f32.mrf.mxu1 }
 0x305   :  { %v700_v57 = vsel %vm91_vm0, %v1876_v50, -inf }
 0x306   :  { %v1520_v51 = vpop.f32.mrf.mxu1 }
 0x30d   :  { %737 = vrot.lane.b32.xlu1 %v1831_v29, %s1724_s17 }
 0x311   :  { %816 = vrot.lane.b32.xlu1 %v1831_v29, %s1725_s18 }
 0x312   :  { %v693_v52 = vpop.xlane.xlu0 %692 }
 0x313   :  { %v703_v53 = vsub.f32 %v441_v42, %v693_v52 }
 0x315   :  { %v707_v54 = vmul.f32 1.442695, %v703_v53  ;;  %814 = vrot.lane.b32.xlu1 %v1834_v31, %s1725_s18 }
 0x317   :  { %1587 = vpow2.f32 %v707_v54 }
 0x324   :  { %v1588_v55 = vpop.eup %1587 }
 0x325   :  { %v715_v56 = vsel %vm91_vm0, %v1588_v55, 0.0 }
 0x326   :  { %716 = vadd.xlane.f32.xlu0 %v715_v56 }
 0x339   :  { %701 = vmax.xlane.f32.xlu1 %v700_v57 }
 0x34a   :  { %893 = vrot.lane.b32.xlu1 %v1792_v9, %s1717_s2 }
 0x34e   :  { %1045 = vrot.lane.b32.xlu1 %v1834_v31, %s1726_s19 }
 0x352   :  { %1203 = vrot.lane.b32.xlu1 %v1831_v29, %s1727_s20 }
 0x356   :  { %969 = vrot.lane.b32.xlu1 %v1794_v11, %s1717_s2 }
 0x35a   :  { %1280 = vrot.lane.b32.xlu1 %v1781_v3, %s1717_s2  ;;  %v697_v3 = vsel %vm91_vm0, %v1874_v48, -inf }
 0x385   :  { %v696_v58 = vpop.xlane.xlu1 %695 }
 0x386   :  { %v704_v59 = vsub.f32 %v523_v45, %v696_v58 }
 0x388   :  { %v709_v60 = vmul.f32 1.442695, %v704_v59 }
 0x389   :  { %v738_v61 = vpop.permute.xlu1 %737 }
 0x38a   :  { %1589 = vpow2.f32 %v709_v60  ;;  %1522 = vmatpush3.msra.mxu0 %v738_v61 }
 0x38b   :  { %1523 = vmatprep.subr.mxu0 %v1719_v12 }
 0x38d   :  { %v817_v0 = vpop.permute.xlu1 %816 }
 0x391   :  { %v815_v1 = vpop.permute.xlu1 %814 }
 0x397   :  { %v1590_v62 = vpop.eup %1589 }
 0x398   :  { %v718_v63 = vsel %vm91_vm0, %v1590_v62, 0.0 }
 0x399   :  { %719 = vadd.xlane.f32.xlu0 %v718_v63 }
 0x3af   :  { %735 = vrot.lane.b32.xlu0 %v1834_v31, %s1724_s17  ;;  %v717_v5 = vpop.xlane.xlu0 %716 }
 0x3b0   :  { %1591 = vrcp.f32 %v717_v5 }
 0x3bd   :  { %v1592_v8 = vpop.eup %1591 }
 0x3be   :  { %v731_v10 = vmul.f32 %v1592_v8, %v1588_v55 }
 0x3c2   :  { %v702_v2 = vpop.xlane.xlu1 %701 }
 0x3c3   :  { %v706_v18 = vsub.f32 %v1876_v50, %v702_v2 }
 0x3c5   :  { %v713_v21 = vmul.f32 1.442695, %v706_v18 }
 0x3c6   :  { %v894_v4 = vpop.permute.xlu1 %893 }
 0x3c7   :  { %1536 = vmatpush3.msra.mxu1 %v894_v4 }
 0x3c8   :  { %1545 = vmatprep.subr.mxu1 %v1719_v12 }
 0x3ca   :  { %v1046_v11 = vpop.permute.xlu1 %1045 }
 0x3ce   :  { %698 = vmax.xlane.f32.xlu0 %v697_v3  ;;  %v1204_v14 = vpop.permute.xlu1 %1203 }
 0x3d2   :  { %v970_v17 = vpop.permute.xlu1 %969 }
 0x3d6   :  { %v1281_v43 = vpop.permute.xlu1 %1280 }
 0x3e4   :  { %1047 = vrot.lane.b32.xlu0 %v1831_v29, %s1726_s19 }
 0x422   :  { %v720_v6 = vpop.xlane.xlu0 %719 }
 0x423   :  { %1593 = vrcp.f32 %v720_v6 }
 0x426   :  { %v736_v9 = vpop.permute.xlu0 %735 }
 0x427   :  { %1524 = vmatpush3.msra.mxu0 %v736_v9 }
 0x428   :  { %1526 = vmatmul.mubr.msk.f32.vlgmr.msra.gmra.mxu0 %vm91_vm0, %v731_v10  ;;  %1528 = vmatprep.subr.mxu0 %v1719_v12 }
 0x429   :  { %1529 = vmatpush3.msra.mxu0 %v817_v0  ;;  %1532 = vmatprep.mubr.msk.f32.mxu0 %vm1720_vm1, %v1719_v12 }
 0x42a   :  { %1530 = vmatprep.subr.mxu0 %v1719_v12 }
 0x42b   :  { %1531 = vmatpush3.msra.mxu0 %v815_v1 }
 0x42c   :  { %1540 = vmatprep.subr.mxu0 %v1719_v12 }
 0x430   :  { %v1594_v15 = vpop.eup %1593 }
 0x431   :  { %v732_v16 = vmul.f32 %v1594_v15, %v1590_v62 }
 0x433   :  { %1533 = vmatmul.mubr.msk.f32.vlgmr.msra.gmra.mxu0 %vm91_vm0, %v732_v16 }
 0x434   :  { %1541 = vmatpush3.msra.mxu0 %v970_v17  ;;  %1542 = vmatprep.mubr.msk.f32.mxu0 %vm1720_vm1, %v1719_v12 }
 0x435   :  { %1552 = vmatprep.subr.mxu0 %v1719_v12 }
 0x457   :  { %v699_v19 = vpop.xlane.xlu0 %698 }
 0x458   :  { %v705_v20 = vsub.f32 %v1874_v48, %v699_v19 }
 0x45a   :  { %v711_v22 = vmul.f32 1.442695, %v705_v20 }
 0x45b   :  { %v1048_v29 = vpop.permute.xlu0 %1047 }
 0x45c   :  { %1595 = vpow2.f32 %v711_v22 }
 0x45d   :  { %1597 = vpow2.f32 %v713_v21 }
 0x469   :  { %v1596_v23 = vpop.eup %1595 }
 0x46a   :  { %v721_v24 = vsel %vm91_vm0, %v1596_v23, 0.0  ;;  %v1598_v25 = vpop.eup %1597 }
 0x46b   :  { %722 = vadd.xlane.f32.xlu0 %v721_v24  ;;  %v724_v26 = vsel %vm91_vm0, %v1598_v25, 0.0 }
 0x46f   :  { %725 = vadd.xlane.f32.xlu0 %v724_v26 }
 0x485   :  { %1201 = vrot.lane.b32.xlu0 %v1834_v31, %s1727_s20 }
 0x489   :  { %1124 = vrot.lane.b32.xlu0 %v1786_v7, %s1717_s2 }
 0x48d   :  { %1357 = vrot.lane.b32.xlu0 %v1813_v13, %s1717_s2 }
 0x4e8   :  { %v810_v27 = vpop.f32.mrf.mxu0 }
 0x4e9   :  { %1543 = vmatmul.mubr.msk.f32.vlgmr.msra.gmra.mxu0 %vm365_vm4, %v810_v27 }
 0x4ea   :  { %v1527_v28 = vpop.f32.mrf.mxu0  ;;  %1554 = vmatprep.mubr.msk.f32.mxu0 %vm1720_vm1, %v1719_v12 }
 0x4f3   :  { %v889_v30 = vpop.f32.mrf.mxu0 }
 0x4f4   :  { %v723_v32 = vpop.xlane.xlu0 %722  ;;  %1538 = vmatmul.mubr.msk.f32.vlgmr.msra.gmra.mxu1 %vm365_vm4, %v889_v30 }
 0x4f5   :  { %1599 = vrcp.f32 %v723_v32  ;;  %1546 = vmatpush3.msra.mxu1 %v1048_v29  ;;  %v1534_v31 = vpop.f32.mrf.mxu0  ;;  %1549 = vmatprep.mubr.msk.f32.mxu1 %vm1720_vm1, %v1719_v12 }
 0x4f6   :  { %1547 = vmatprep.subr.mxu1 %v1719_v12 }
 0x4f7   :  { %1548 = vmatpush3.msra.mxu1 %v1046_v11 }
 0x4f8   :  { %v726_v7 = vpop.xlane.xlu0 %725  ;;  %1557 = vmatprep.subr.mxu1 %v1719_v12 }
 0x4f9   :  { %1601 = vrcp.f32 %v726_v7 }
 0x4fc   :  { %v1202_v35 = vpop.permute.xlu0 %1201 }
 0x500   :  { %v1125_v37 = vpop.permute.xlu0 %1124 }
 0x501   :  { %1553 = vmatpush3.msra.mxu0 %v1125_v37 }
 0x502   :  { %v1600_v13 = vpop.eup %1599  ;;  %1564 = vmatprep.subr.mxu0 %v1719_v12 }
 0x503   :  { %v733_v33 = vmul.f32 %v1600_v13, %v1596_v23 }
 0x504   :  { %v1358_v52 = vpop.permute.xlu0 %1357 }
 0x505   :  { %1550 = vmatmul.mubr.msk.f32.vlgmr.msra.gmra.mxu1 %vm91_vm0, %v733_v33 }
 0x506   :  { %v1602_v34 = vpop.eup %1601  ;;  %1558 = vmatpush3.msra.mxu1 %v1204_v14  ;;  %1561 = vmatprep.mubr.msk.f32.mxu1 %vm1720_vm1, %v1719_v12 }
 0x507   :  { %1559 = vmatprep.subr.mxu1 %v1719_v12  ;;  %v734_v36 = vmul.f32 %v1602_v34, %v1598_v25 }
 0x508   :  { %1560 = vmatpush3.msra.mxu1 %v1202_v35 }
 0x509   :  { %1562 = vmatmul.mubr.msk.f32.vlgmr.msra.gmra.mxu1 %vm91_vm0, %v734_v36 }
 0x5a9   :  { %v1041_v38 = vpop.f32.mrf.mxu0 }
 0x5ab   :  { %v1544_v39 = vpop.f32.mrf.mxu0 }
 0x5b4   :  { %v965_v40 = vpop.f32.mrf.mxu1 }
 0x5b5   :  { %v1042_v41 = vadd.f32 %v1041_v38, %v965_v40 }
 0x5b6   :  { %v1539_v42 = vpop.f32.mrf.mxu1 }
 0x5c5   :  { %v1120_v44 = vpop.f32.mrf.mxu1 }
 0x5c6   :  { %1555 = vmatmul.mubr.msk.f32.vlgmr.msra.gmra.mxu0 %vm365_vm4, %v1120_v44 }
 0x5c7   :  { %1565 = vmatpush3.msra.mxu0 %v1281_v43  ;;  %v1551_v45 = vpop.f32.mrf.mxu1  ;;  %1566 = vmatprep.mubr.msk.f32.mxu0 %vm1720_vm1, %v1719_v12 }
 0x5c9   :  { %v1276_v46 = vpop.f32.mrf.mxu1 }
 0x5ca   :  { %1567 = vmatmul.mubr.msk.f32.vlgmr.msra.gmra.mxu0 %vm365_vm4, %v1276_v46 }
 0x5cb   :  { %v1563_v47 = vpop.f32.mrf.mxu1 }
 0x686   :  { %v1196_v48 = vpop.f32.mrf.mxu0 }
 0x687   :  { %v1200_v50 = vadd.f32 %v1196_v48, %v1042_v41 }
 0x688   :  { %v1556_v49 = vpop.f32.mrf.mxu0 }
 0x68a   :  { %v1352_v51 = vpop.f32.mrf.mxu0 }
 0x68b   :  { %v1356_v53 = vadd.f32 %v1352_v51, %v1200_v50 }
 0x68c   :  { %v1568_v54 = vpop.f32.mrf.mxu0 }
 0x68d   :  { %v1360_v55 = vadd.f32 %v1358_v52, %v1356_v53 }
 0x68f   :  { %1361 = vst.msk [vmem:[#allocation10] sm:$0xff] %vm181_vm2, %v1360_v55 }
 0x690   :  { %1694 = shalt.err (!%p1691_p10)
}
 0x691   :  { %1371 = dma.vmem_to_hbm [thread:$0]  %s1369_s22, 128, %s1949_s5, [#allocation4]  }
 0x692   :  { %1709 = dma.done.wait [#allocation4], 128  }
 0x693   :  { %1710 = vsyncadd [#allocation4], 4294967168 }
 0x694   :  { %1375 = vsyncpa [#allocation3], 1 }
 0x695   :  { %1376 = vsyncpa [#allocation6], 1 }
 0x696   :  { %1377 = vsyncpa [#allocation9], 1 }
 0x697   :  { %1378 = vsyncpa [#allocation4], 1 }

</bundles_post_ra>
